<compile_context>
chip_gen: v6e
topology: v6e:2x2x1
jax: 0.10.0
libtpu: 0.0.40
codegen_flags: <defaults>
</compile_context>

<pallas_src>
import jax
import jax.numpy as jnp
from jax.experimental import pallas as pl
from jax.experimental.pallas import tpu as pltpu


def _round_up(x, m):
    return (x + m - 1) // m * m


# ---------------------------------------------------------------------------
# Kernels
# ---------------------------------------------------------------------------

def _mm_bias_kernel(x_ref, w_ref, b_ref, o_ref):
    """One (tn, th) output tile: o = x_tile @ W_tile + b_tile.

    Inputs may be bf16; accumulation is forced to f32 on the MXU and the bias
    add / store happen in f32 before the cast to the output dtype.
    """
    o_ref[...] = (
        jnp.dot(x_ref[...], w_ref[...], preferred_element_type=jnp.float32)
        + b_ref[...]
    ).astype(o_ref.dtype)


def _mm_bias_ktiled_kernel(x_ref, w_ref, b_ref, o_ref, acc_ref):
    """Same as above but with the contraction dim tiled over grid axis 2."""
    k = pl.program_id(2)

    @pl.when(k == 0)
    def _():
        acc_ref[...] = jnp.zeros_like(acc_ref)

    acc_ref[...] += jnp.dot(x_ref[...], w_ref[...],
                            preferred_element_type=jnp.float32)

    @pl.when(k == pl.num_programs(2) - 1)
    def _():
        o_ref[...] = (acc_ref[...] + b_ref[...]).astype(o_ref.dtype)


# ---------------------------------------------------------------------------
# Wrapper
# ---------------------------------------------------------------------------

def collapse_polynet_params(weights, biases):
    """Fold the K per-term linear layers into one.  Do this ONCE at setup:
         sum_k (x @ W_k + b_k) == x @ (sum_k W_k) + sum_k b_k
    weights: (K, d, H), biases: (K, H)  ->  (d, H), (H,)
    """
    return jnp.sum(weights, axis=0), jnp.sum(biases, axis=0)


def polynet_forward(x, w_sum, b_sum, *, use_bf16=True,
                    tile_n=256, tile_h=512, tile_k=512):
    """
    x     : (N, d)  float32
    w_sum : (d, H)  float32  (pre-collapsed weights, see collapse_polynet_params)
    b_sum : (H,)    float32  (pre-collapsed bias)
    returns (N, H)  float32  ==  x @ w_sum + b_sum
    """
    N, d = x.shape
    d2, H = w_sum.shape
    assert d == d2 and b_sum.shape == (H,)

    out_dtype = x.dtype
    cdtype = jnp.bfloat16 if use_bf16 else x.dtype     # MXU operand dtype
    cb = jnp.dtype(cdtype).itemsize
    ob = jnp.dtype(out_dtype).itemsize

    # ---- tile selection -----------------------------------------------------
    h_pad = _round_up(H, 128)                          # lane-dense stores
    k_tiled = d > 2 * tile_k                           # only tile d when big
    if k_tiled:
        tk = tile_k
        d_pad = _round_up(d, tk)                       # zero-padded contraction
    else:
        tk = d_pad = d                                 # contraction exact

    # tiny contraction -> store/DMA-bound: keep the whole H slab per tile
    w_slab_bytes = d_pad * h_pad * cb
    if d_pad <= 128 and 2 * w_slab_bytes <= (8 << 20):
        th = h_pad
    else:
        th = min(tile_h, h_pad)
    h_pad = _round_up(h_pad, th)                       # every H tile is full

    tn = min(tile_n, _round_up(N, 8))                  # sublane multiple

    n_i = pl.cdiv(N, tn)
    n_j = h_pad // th
    n_k = d_pad // tk

    # v7x has 2 TensorCores: make sure >=2 parallel grid blocks when possible.
    if n_i * n_j == 1:
        if th >= 256:
            th //= 2
            n_j = h_pad // th
        elif tn >= 16:
            tn = _round_up(tn // 2, 8)
            n_i = pl.cdiv(N, tn)

    # ---- operand prep (bf16 cast, lane pad of H; N stays ragged) ------------
    x_p = x if d_pad == d else jnp.pad(x, ((0, 0), (0, d_pad - d)))
    x_p = x_p.astype(cdtype)
    w_p = jnp.pad(w_sum, ((0, d_pad - d), (0, h_pad - H))).astype(cdtype)
    b_p = jnp.pad(b_sum, (0, h_pad - H))[None, :].astype(jnp.float32)

    # ---- grid / specs --------------------------------------------------------
    if n_k == 1:
        # Keep the BIGGER operand's block index constant along the inner grid
        # axis so Pallas skips its re-fetch and it streams HBM exactly once.
        swap_ij = (d_pad * h_pad) > (N * d_pad)        # W bytes > X bytes
        if swap_ij:
            grid = (n_j, n_i)
            x_map = lambda j, i: (i, 0)
            w_map = lambda j, i: (0, j)
            b_map = lambda j, i: (0, j)
            o_map = lambda j, i: (i, j)
        else:
            grid = (n_i, n_j)
            x_map = lambda i, j: (i, 0)
            w_map = lambda i, j: (0, j)
            b_map = lambda i, j: (0, j)
            o_map = lambda i, j: (i, j)
        kernel = _mm_bias_kernel
        scratch = []
        semantics = ("parallel", "parallel")
    else:
        grid = (n_i, n_j, n_k)                         # reduction axis last
        x_map = lambda i, j, k: (i, k)
        w_map = lambda i, j, k: (k, j)
        b_map = lambda i, j, k: (0, j)
        o_map = lambda i, j, k: (i, j)
        kernel = _mm_bias_ktiled_kernel
        scratch = [pltpu.VMEM((tn, th), jnp.float32)]
        semantics = ("parallel", "parallel", "arbitrary")

    # Explicit VMEM budget: double-buffered inputs + double-buffered output
    # tile (+ f32 accumulator when k-tiled), with generous slack but capped
    # below v7x's 64 MiB physical ceiling.
    est = 2 * (tn * tk * cb + tk * th * cb + th * 4) + 2 * tn * th * ob
    if n_k > 1:
        est += tn * th * 4
    vmem_limit = int(max(32 << 20, min(3 * est, 64 << 20)))

    cost = pl.CostEstimate(
        flops=int(2 * N * d_pad * h_pad),
        transcendentals=0,
        bytes_accessed=int(x_p.size * cb + w_p.size * cb
                           + b_p.size * 4 + N * h_pad * ob),
    )

    out_p = pl.pallas_call(
        kernel,
        out_shape=jax.ShapeDtypeStruct((N, h_pad), out_dtype),
        grid_spec=pltpu.PrefetchScalarGridSpec(
            num_scalar_prefetch=0,
            grid=grid,
            in_specs=[
                pl.BlockSpec((tn, tk), x_map),   # activation row tile
                # If a profile shows exposed weight DMA after k-tiling, add
                # pipeline_mode=pl.Buffered(3) on this spec only.
                pl.BlockSpec((tk, th), w_map),   # collapsed weights
                pl.BlockSpec((1, th), b_map),    # collapsed bias (f32)
            ],
            out_specs=pl.BlockSpec((tn, th), o_map),
            scratch_shapes=scratch,
        ),
        compiler_params=pltpu.CompilerParams(
            dimension_semantics=semantics,
            vmem_limit_bytes=vmem_limit,
        ),
        cost_estimate=cost,
    )(x_p, w_p, b_p)

    return out_p[:, :H]


# ---------------------------------------------------------------------------
# Reference / demo
# ---------------------------------------------------------------------------

def _reference_forward(x, weights, biases):
    """Pure-JAX f32 reference for the implied PolyNet forward."""
    return jnp.einsum("nd,kdh->nh", x, weights) + biases.sum(axis=0)[None, :]


def _init_params(key, idxset, d, H, a=-1.0, b=1.0):
    """Deterministic synthetic init mirroring xavier_init():
       weights ~ xavier-uniform, biases ~ U[a, b]."""
    K = len(idxset)
    kw, kb = jax.random.split(key)
    limit = jnp.sqrt(6.0 / (d + H))   # xavier_uniform bound for a (d -> H) layer
    weights = jax.random.uniform(kw, (K, d, H), jnp.float32, -limit, limit)
    biases = jax.random.uniform(kb, (K, H), jnp.float32, a, b)
    return weights, biases


if __name__ == "__main__":
    key = jax.random.PRNGKey(0)
    k_x, k_p = jax.random.split(key)

    # Synthetic `pinfo`: 4 multi-indices over a d=4 dimensional domain [-1, 1]^d.
    idxset = [(1, 0, 0, 0), (0, 1, 0, 0), (1, 1, 0, 0), (2, 0, 0, 0)]
    N, d, H = 8, 4, 32                      # N sample points of dimension d; width H

    x = jax.random.uniform(k_x, (N, d), jnp.float32, -1.0, 1.0)
    weights, biases = _init_params(k_p, idxset, d, H, a=-1.0, b=1.0)

    # One-time setup: fold the K per-term linear layers (hoisted out of hot path).
    w_sum, b_sum = collapse_polynet_params(weights, biases)

    out = jax.block_until_ready(polynet_forward(x, w_sum, b_sum, use_bf16=True))

    ref = _reference_forward(x, weights, biases)
    assert out.shape == (N, H)
    # bf16 MXU operands (f32 accumulate): tolerance loosened vs the f32 reference.
    assert jnp.allclose(out, ref, atol=5e-2, rtol=5e-2), "mismatch vs JAX reference"

    print("KERNEL_OK")
</pallas_src>

<mosaic_0001>
module attributes {stable_mosaic.version = 11 : i64} {
  func.func @_mm_bias_kernel(%arg0: i32, %arg1: i32, %arg2: memref<8x4xbf16, #tpu.memory_space<vmem>>, %arg3: memref<4x128xbf16, #tpu.memory_space<vmem>>, %arg4: memref<1x128xf32, #tpu.memory_space<vmem>>, %arg5: memref<8x128xf32, #tpu.memory_space<vmem>>) attributes {dimension_semantics = [#tpu.dimension_semantics<parallel>, #tpu.dimension_semantics<parallel>], iteration_bounds = array<i64: 1, 1>, scalar_prefetch = 0 : i64, scratch_operands = 0 : i64, tpu.core_type = #tpu.core_type<tc>, window_params = [{transform_indices = @transform_0, window_bounds = array<i64: 8, 4>}, {transform_indices = @transform_1, window_bounds = array<i64: 4, 128>}, {transform_indices = @transform_2, window_bounds = array<i64: 1, 128>}, {transform_indices = @transform_3, window_bounds = array<i64: 8, 128>}]} {
    %c0 = arith.constant 0 : index
    %c0_0 = arith.constant 0 : index
    %0 = vector.load %arg2[%c0, %c0_0] : memref<8x4xbf16, #tpu.memory_space<vmem>>, vector<8x4xbf16>
    %c0_1 = arith.constant 0 : index
    %c0_2 = arith.constant 0 : index
    %1 = vector.load %arg3[%c0_1, %c0_2] : memref<4x128xbf16, #tpu.memory_space<vmem>>, vector<4x128xbf16>
    %cst = arith.constant dense<0.000000e+00> : vector<8x128xf32>
    %2 = tpu.matmul %0, %1, %cst {dimension_numbers = #tpu.dot_dimension_numbers<[1], [0], [0], [1], [0, 0, 1, 1], [], []>} : vector<8x4xbf16>, vector<4x128xbf16>, vector<8x128xf32> -> vector<8x128xf32>
    %c0_3 = arith.constant 0 : index
    %c0_4 = arith.constant 0 : index
    %3 = vector.load %arg4[%c0_3, %c0_4] : memref<1x128xf32, #tpu.memory_space<vmem>>, vector<1x128xf32>
    %4 = vector.broadcast %3 : vector<1x128xf32> to vector<8x128xf32>
    %5 = arith.addf %2, %4 : vector<8x128xf32>
    %c0_5 = arith.constant 0 : index
    %c0_6 = arith.constant 0 : index
    %6 = vector.load %arg5[%c0_5, %c0_6] : memref<8x128xf32, #tpu.memory_space<vmem>>, vector<8x128xf32>
    tpu.vector_store %arg5[%c0_5, %c0_6], %5 {strides = array<i32>} : memref<8x128xf32, #tpu.memory_space<vmem>>, vector<8x128xf32>,
    return
  }
  func.func @transform_0(%arg0: i32, %arg1: i32) -> (i32, i32) {
    %c0_i32 = arith.constant 0 : i32
    %c0_i32_0 = arith.constant 0 : i32
    return %arg1, %c0_i32 : i32, i32
  }
  func.func @transform_1(%arg0: i32, %arg1: i32) -> (i32, i32) {
    %c0_i32 = arith.constant 0 : i32
    %c0_i32_0 = arith.constant 0 : i32
    return %c0_i32, %arg0 : i32, i32
  }
  func.func @transform_2(%arg0: i32, %arg1: i32) -> (i32, i32) {
    %c0_i32 = arith.constant 0 : i32
    %c0_i32_0 = arith.constant 0 : i32
    return %c0_i32, %arg0 : i32, i32
  }
  func.func @transform_3(%arg0: i32, %arg1: i32) -> (i32, i32) {
    %c0_i32 = arith.constant 0 : i32
    return %arg1, %arg0 : i32, i32
  }
}

</mosaic_0001>

<bundles_post_ra>
// kernel: tpu_custom_call.1
= control target key start
LH: loop header
LB: loop body
LE: loop exit
PB: predicated region body
PF: predicated region fallthrough
CT: control target
= control target key end

     0   :  { %vm29_vm0 = vcmask 1041408   ;;  %v123_v1 = vmov 0.0   ;;  %vm124_vm1 = vmmov 0   ;;  %vm25_vm2 = vcmask 31744   ;;  %s158_s0 = inlined_call_operand.vmem [shape: bf16[8,4], index: 0, kind: input, shape index: {}]   ;;  %s159_s1 = inlined_call_operand.vmem [shape: bf16[4,128], index: 1, kind: input, shape index: {}]   ;;  %s160_s2 = inlined_call_operand.vmem [shape: f32[1,128], index: 2, kind: input, shape index: {}]   ;;  %s161_s3 = inlined_call_operand.hbm [shape: f32[8,128], index: 3, kind: output, shape index: {}]  }
   0x1   :  { %v17_v0 = vld [vmem:[%s159_s1] sm:$0x3]  ;;  %92 = vmatprep.subr.bf16.mxu0 %v123_v1  ;;  %94 = vmatprep.mubr.msk.bf16.mxu0 %vm124_vm1, %v123_v1 }
   0x2   :  { %v31_v2 = vsel %vm29_vm0, %v17_v0, 0  ;;  %v16_v3 = vld [vmem:[%s158_s0] sm:$0xf] }
   0x3   :  { %93 = vmatpush3.bf16.msra.mxu0 %v31_v2 }
   0x4   :  { %8 = vsyncpa [#allocation3], 0  ;;  %v88_v4 = vld [vmem:[%s160_s2] ss:$0 sm:$0xff]  ;;  %s125_s18 = smov [#allocation2]  }
   0x5   :  { %s80_s1 = sshll.u32 %s125_s18, 4  ;;  %s81_s1 = int_to_ptr.vmem [resolvable:$true] %s80_s1 }
   0x6   :  { %95 = vmatmul.mubr.msk.bf16.vlgmr.msra.gmra.mxu0 %vm25_vm2, %v16_v3  ;;  %s101_s19 = scalar_lea.vmem %s81_s1, 128  ;;  %p106_p1 = scmp.lt.s32.totalorder %s81_s1, %s81_s1 }
   0x7   :  { %p102_p0 = scmp.ne.s32.totalorder %s81_s1, %s101_s19  ;;  %p107_p2 = scmp.lt.s32.totalorder %s101_s19, %s101_s19 }
   0x9   :  { %p108_p3 = por %p107_p2, %p106_p1 }
   0xb   :  { %p109_p4 = pnand %p108_p3, %p102_p0 }
  0xc6   :  { %v67_v5 = vpop.f32.mrf.mxu0 }
  0xc7   :  { %v68_v6 = vadd.f32 %v88_v4, %v67_v5 }
  0xc8   :  { %v96_v7 = vpop.f32.mrf.mxu0 }
  0xc9   :  { %73 = vst [vmem:[#allocation2] sm:$0xff] %v68_v6 }
  0xca   :  { %v70_v8 = vpop.f32.mrf.mxu0 }
  0xcb   :  { %112 = shalt.err (!%p109_p4)
}
  0xcc   :  { %83 = dma.vmem_to_hbm [thread:$0]  %s81_s1, 128, %s161_s3, [#allocation3]   ;;  %v97_v9 = vpop.f32.mrf.mxu0 }
  0xcd   :  { %121 = dma.done.wait [#allocation3], 128  }
  0xce   :  { %122 = vsyncadd [#allocation3], 4294967168 }
  0xcf   :  { %87 = vsyncpa [#allocation3], 1 }

</bundles_post_ra>
